<compile_context>
chip_gen: v7x
topology: tpu7x:2x2x1
jax: 0.10.0
libtpu: 0.0.40
codegen_flags: <defaults>
</compile_context>

<pallas_src>
import functools

import jax
import jax.numpy as jnp
import numpy as np
from jax.experimental import pallas as pl
from jax.experimental.pallas import tpu as pltpu

# ---- hparams of the synthetic AllPassWarpModel instance --------------------
WARP_MATRIX_SIZE = 16                                   # hparams.warp_matrix_size
ADD_DELTAS = True                                       # hparams.add_deltas
SPD = WARP_MATRIX_SIZE * (3 if ADD_DELTAS else 1)       # spectral_features_dim = 48
EXTRA_FEATS = 4                                         # lf0/vuv/bap-style passthrough feats
DIM_IN = SPD + EXTRA_FEATS                              # 52
ALPHA_RANGE = 0.2                                       # hparams.alpha_ranges = [0.2]
KP1 = 4                                                 # Taylor terms of the warp matrix
T, B = 16, 2                                            # time-major input [T, B, D]


def _round_up(x, m):
    return ((x + m - 1) // m) * m


def _choose_tile_f(F):
    """Frames per grid step.

    Big tiles amortise the ~0.35us per-grid-step pipeline overhead (after the
    Horner restructure 1024-row tiles fit VMEM easily), while keeping an even
    number (>=2) of grid steps whenever possible so
    dimension_semantics=("parallel",) load-balances v7x's two TensorCores.
    Partial trailing blocks are masked by Pallas, so no frame padding pass.
    """
    f8 = _round_up(max(F, 1), 8)
    if f8 <= 8:
        return 8
    tile = min(1024, _round_up(pl.cdiv(f8, 2), 8))
    steps = pl.cdiv(F, tile)
    if steps > 1 and steps % 2:            # keep the step count even for v7x
        tile = _round_up(pl.cdiv(F, steps + 1), 8)
    return tile


# ---------------------------------------------------------------------------
# Pallas kernel: alpha-layer Linear + tanh*range, denormalise, all-pass warp
# (Horner over the Taylor terms, each narrow matmul consumed immediately),
# re-normalise.  Everything stays at the native 52-lane width; the trailing
# passthrough features ride through the MXU via an identity block in the
# alpha^0 slab.  alpha is written to its own (tile_f, 1) output.
# ---------------------------------------------------------------------------
def _allpass_warp_kernel(x_ref, vp_ref, w_ref, b_ref, out_ref, alpha_ref, *,
                         kp1, alpha_range):
    x = x_ref[...]                                  # [TF, D] f32, native width

    wa = vp_ref[0:1, :]                             # alpha Linear weight   [1, D]
    mean = vp_ref[1:2, :]                           # mean buffer (0 beyond SPD)
    std = vp_ref[2:3, :]                            # std buffer  (1 beyond SPD)
    inv_std = vp_ref[3:4, :]                        # exact precomputed 1/std

    # ---- alpha layer: nn.Linear(D, 1) -> tanh -> * alpha_range -------------
    # elementwise mul + lane-sum (XLU) + tanh (EUP): keeps the VALU slots free.
    lin = jnp.sum(x * wa, axis=-1, keepdims=True) + b_ref[0, 0]
    alpha = jnp.tanh(lin) * alpha_range             # [TF, 1]
    alpha_ref[...] = alpha

    # ---- _denormalise(output[..., :spd]); extra feats have mean=0 / std=1 ---
    sp = x * std + mean                             # [TF, D]

    # ---- AllPassWarp: Horner over the Taylor terms of M(alpha) --------------
    # acc = sp@W0 + a*(sp@W1 + a*(sp@W2 + a*(sp@W3))).  Each 52-wide matmul is
    # consumed immediately -> no [TF, K*128] intermediate, no vreg spills.
    # The alpha^0 slab carries an identity block on rows/cols [SPD:DIM_IN), so
    # the non-spectral passthrough comes out of the same matmul for free.
    # TODO(synk): 2/3 of these MACs hit structural zeros of the block-diagonal
    # warp matrices; kept dense since the kernel is memory-bound, not MXU-bound.
    acc = jnp.dot(sp, w_ref[kp1 - 1], preferred_element_type=jnp.float32)
    for k in range(kp1 - 2, -1, -1):
        acc = jnp.dot(sp, w_ref[k], preferred_element_type=jnp.float32) + alpha * acc

    # ---- _normalise(warped slice) with the precomputed exact reciprocal -----
    # (mean=0 / inv_std=1 beyond SPD -> trailing features pass through exactly)
    out_ref[...] = (acc - mean) * inv_std


# ---------------------------------------------------------------------------
# One-time parameter packing (hoisted out of the per-call path)
# ---------------------------------------------------------------------------
def prepare_params(w_alpha, b_alpha, mean, std_dev, w3):
    # Merge the four per-feature constant vectors into one (4, D) operand:
    #   row 0: alpha Linear weight, row 1: mean, row 2: std, row 3: 1/std.
    std_ext = jnp.ones((DIM_IN,), jnp.float32).at[:SPD].set(std_dev[0].astype(jnp.float32))
    vec = jnp.zeros((4, DIM_IN), jnp.float32)
    vec = vec.at[0, :].set(w_alpha[0].astype(jnp.float32))
    vec = vec.at[1, :SPD].set(mean[0].astype(jnp.float32))
    vec = vec.at[2, :].set(std_ext)
    vec = vec.at[3, :].set(1.0 / std_ext)

    # Taylor warp matrices extended to the full feature width; the alpha^0 slab
    # gets an identity block for the trailing passthrough features.
    # TODO(synk): optionally cast w_full to bfloat16 for the MXU (f32 accum);
    # kept f32 so the 1e-5 alpha tolerance is comfortably met.
    w_full = jnp.zeros((KP1, DIM_IN, DIM_IN), jnp.float32)
    w_full = w_full.at[:, :SPD, :SPD].set(w3.astype(jnp.float32))
    w_full = w_full.at[0, SPD:, SPD:].set(jnp.eye(EXTRA_FEATS, dtype=jnp.float32))

    b_alpha = jnp.asarray(b_alpha, jnp.float32).reshape(1, 1)
    return b_alpha, vec, w_full


# ---------------------------------------------------------------------------
# Wrapper: jitted forward, native-width I/O, alpha as a second kernel output
# ---------------------------------------------------------------------------
@jax.jit
def allpass_warp_forward(inputs, b_alpha, vec_params, w_full):
    Tn, Bn, D = inputs.shape
    F = Tn * Bn
    tile_f = _choose_tile_f(F)
    steps = pl.cdiv(F, tile_f)

    x = inputs.reshape(F, D)          # contiguous time-major flatten (no copy)

    kernel = functools.partial(_allpass_warp_kernel, kp1=KP1,
                               alpha_range=ALPHA_RANGE)

    out, alpha = pl.pallas_call(
        kernel,
        out_shape=(jax.ShapeDtypeStruct((F, D), jnp.float32),
                   jax.ShapeDtypeStruct((F, 1), jnp.float32)),
        grid_spec=pltpu.PrefetchScalarGridSpec(
            num_scalar_prefetch=0,
            grid=(steps,),
            in_specs=[
                pl.BlockSpec((tile_f, D), lambda i: (i, 0)),           # frames (native width)
                pl.BlockSpec((4, D), lambda i: (0, 0)),                # packed constant vectors
                pl.BlockSpec((KP1, D, D), lambda i: (0, 0, 0)),        # Taylor warp matrices
                pl.BlockSpec(memory_space=pltpu.MemorySpace.SMEM),     # alpha Linear bias scalar
            ],
            out_specs=[
                pl.BlockSpec((tile_f, D), lambda i: (i, 0)),           # warped output
                pl.BlockSpec((tile_f, 1), lambda i: (i, 0)),           # alpha
            ],
        ),
        compiler_params=pltpu.CompilerParams(
            dimension_semantics=("parallel",),
            vmem_limit_bytes=32 * 1024 * 1024,
        ),
    )(x, vec_params, w_full, b_alpha)

    new_output = out.reshape(Tn, Bn, D)
    alphas = [alpha.reshape(Tn, Bn, 1)]   # one entry per warping layer (alpha_ranges)
    hidden = None                         # no pre-net -> hidden stays as given (None)
    return new_output, (hidden, alphas)


# ---------------------------------------------------------------------------
# Deterministic parameter / buffer construction (synthetic, no checkpoint load)
# ---------------------------------------------------------------------------
def make_params(key):
    k1, k2, k3, k4, k5 = jax.random.split(key, 5)
    w_alpha = jax.random.normal(k1, (1, DIM_IN), jnp.float32) * 0.05   # nn.Linear(D,1).weight
    b_alpha = jax.random.normal(k2, (1, 1), jnp.float32) * 0.05        # nn.Linear(D,1).bias
    mean = jax.random.normal(k3, (1, SPD), jnp.float32) * 0.1          # buffer 'mean'
    std_dev = 0.5 + jax.random.uniform(k4, (1, SPD), jnp.float32)      # buffer 'std_dev'

    # TODO(synk): w_matrix_3d Taylor coefficients are generated synthetically;
    # the analytic all-pass recursion of AllPassWarp.gen_w_matrix_3d (external
    # module) is not reproduced here.
    n = WARP_MATRIX_SIZE
    w_k = jax.random.normal(k5, (KP1, n, n), jnp.float32) * 0.1
    w_k = w_k.at[0].set(jnp.eye(n, dtype=jnp.float32))                 # M(alpha=0) = I

    # Block-diagonal, transposed stacks so kernel/ref can do sp @ W3[k]; the
    # same warp matrix is applied to statics, deltas and delta-deltas.
    blocks = 3 if ADD_DELTAS else 1
    w3 = jnp.zeros((KP1, SPD, SPD), jnp.float32)
    w_k_t = jnp.transpose(w_k, (0, 2, 1))
    for bi in range(blocks):
        w3 = w3.at[:, bi * n:(bi + 1) * n, bi * n:(bi + 1) * n].set(w_k_t)
    return w_alpha, b_alpha, mean, std_dev, w3


# ---------------------------------------------------------------------------
# Pure-JAX reference (mirrors the PyTorch forward)
# ---------------------------------------------------------------------------
def ref_forward(inputs, w_alpha, b_alpha, mean, std_dev, w3):
    lin = jnp.einsum('tbd,od->tbo', inputs, w_alpha) + b_alpha[0]
    alpha = jnp.tanh(lin) * ALPHA_RANGE
    sp = inputs[..., :SPD] * std_dev[0] + mean[0]
    acc = jnp.zeros_like(sp)
    a_pow = jnp.ones_like(alpha)
    for k in range(KP1):
        acc = acc + a_pow * jnp.einsum('tbi,ij->tbj', sp, w3[k])
        a_pow = a_pow * alpha
    out_sp = (acc - mean[0]) / std_dev[0]
    out = jnp.concatenate([out_sp, inputs[..., SPD:]], axis=-1)
    return out, alpha


if __name__ == "__main__":
    key = jax.random.PRNGKey(0)
    kin, kparams = jax.random.split(key)
    inputs = jax.random.normal(kin, (T, B, DIM_IN), jnp.float32)   # [T, B, D] time-major
    w_alpha, b_alpha, mean, std_dev, w3 = make_params(kparams)

    # One-time parameter packing, then the jitted fused forward.
    b_packed, vec_params, w_full = prepare_params(w_alpha, b_alpha, mean, std_dev, w3)
    new_output, (hidden, alphas) = allpass_warp_forward(
        inputs, b_packed, vec_params, w_full)
    new_output = jax.block_until_ready(new_output)
    alphas = [jax.block_until_ready(a) for a in alphas]

    ref_out, ref_alpha = ref_forward(inputs, w_alpha, b_alpha, mean, std_dev, w3)
    np.testing.assert_allclose(np.asarray(new_output), np.asarray(ref_out),
                               rtol=1e-4, atol=1e-4)
    np.testing.assert_allclose(np.asarray(alphas[0]), np.asarray(ref_alpha),
                               rtol=1e-4, atol=1e-5)
    assert new_output.shape == (T, B, DIM_IN) and alphas[0].shape == (T, B, 1)
    print("KERNEL_OK")
</pallas_src>

<mosaic_0001>
module attributes {stable_mosaic.version = 11 : i64} {
  func.func @_allpass_warp_kernel(%arg0: i32, %arg1: memref<16x52xf32, #tpu.memory_space<vmem>>, %arg2: memref<4x52xf32, #tpu.memory_space<vmem>>, %arg3: memref<4x52x52xf32, #tpu.memory_space<vmem>>, %arg4: memref<1x1xf32, #tpu.memory_space<smem>>, %arg5: memref<16x52xf32, #tpu.memory_space<vmem>>, %arg6: memref<16x1xf32, #tpu.memory_space<vmem>>) attributes {dimension_semantics = [#tpu.dimension_semantics<parallel>], iteration_bounds = array<i64: 2>, scalar_prefetch = 0 : i64, scratch_operands = 0 : i64, tpu.core_type = #tpu.core_type<tc>, window_params = [{transform_indices = @transform_0, window_bounds = array<i64: 16, 52>}, {pipeline_mode = #tpu.pipeline_mode<synchronous>, transform_indices = @transform_1, window_bounds = array<i64: 4, 52>}, {pipeline_mode = #tpu.pipeline_mode<synchronous>, transform_indices = @transform_2, window_bounds = array<i64: 4, 52, 52>}, {transform_indices = @transform_3, window_bounds = array<i64: 1, 1>}, {transform_indices = @transform_4, window_bounds = array<i64: 16, 52>}, {transform_indices = @transform_5, window_bounds = array<i64: 16, 1>}]} {
    %c0 = arith.constant 0 : index
    %c0_0 = arith.constant 0 : index
    %0 = vector.load %arg1[%c0, %c0_0] : memref<16x52xf32, #tpu.memory_space<vmem>>, vector<16x52xf32>
    %c0_1 = arith.constant 0 : index
    %c0_2 = arith.constant 0 : index
    %1 = vector.load %arg2[%c0_1, %c0_2] : memref<4x52xf32, #tpu.memory_space<vmem>>, vector<1x52xf32>
    %c1 = arith.constant 1 : index
    %c0_3 = arith.constant 0 : index
    %2 = vector.load %arg2[%c1, %c0_3] : memref<4x52xf32, #tpu.memory_space<vmem>>, vector<1x52xf32>
    %c2 = arith.constant 2 : index
    %c0_4 = arith.constant 0 : index
    %3 = vector.load %arg2[%c2, %c0_4] : memref<4x52xf32, #tpu.memory_space<vmem>>, vector<1x52xf32>
    %c3 = arith.constant 3 : index
    %c0_5 = arith.constant 0 : index
    %4 = vector.load %arg2[%c3, %c0_5] : memref<4x52xf32, #tpu.memory_space<vmem>>, vector<1x52xf32>
    %5 = vector.broadcast %1 : vector<1x52xf32> to vector<16x52xf32>
    %6 = arith.mulf %0, %5 : vector<16x52xf32>
    %cst = arith.constant dense<0.000000e+00> : vector<16xf32>
    %7 = vector.multi_reduction <add>, %6, %cst [1] : vector<16x52xf32> to vector<16xf32>
    %8 = vector.shape_cast %7 : vector<16xf32> to vector<16x1xf32>
    %c0_6 = arith.constant 0 : index
    %c0_7 = arith.constant 0 : index
    %9 = memref.load %arg4[%c0_6, %c0_7] : memref<1x1xf32, #tpu.memory_space<smem>>
    %10 = vector.broadcast %9 : f32 to vector<16x1xf32>
    %11 = arith.addf %8, %10 : vector<16x1xf32>
    %12 = math.tanh %11 : vector<16x1xf32>
    %cst_8 = arith.constant 2.000000e-01 : f32
    %13 = vector.broadcast %cst_8 : f32 to vector<16x1xf32>
    %14 = arith.mulf %12, %13 : vector<16x1xf32>
    %c0_9 = arith.constant 0 : index
    %c0_10 = arith.constant 0 : index
    %15 = vector.load %arg6[%c0_9, %c0_10] : memref<16x1xf32, #tpu.memory_space<vmem>>, vector<16x1xf32>
    tpu.vector_store %arg6[%c0_9, %c0_10], %14 {strides = array<i32>} : memref<16x1xf32, #tpu.memory_space<vmem>>, vector<16x1xf32>,
    %16 = vector.broadcast %3 : vector<1x52xf32> to vector<16x52xf32>
    %17 = arith.mulf %0, %16 : vector<16x52xf32>
    %18 = vector.broadcast %2 : vector<1x52xf32> to vector<16x52xf32>
    %19 = arith.addf %17, %18 : vector<16x52xf32>
    %c3_11 = arith.constant 3 : index
    %c0_12 = arith.constant 0 : index
    %c0_13 = arith.constant 0 : index
    %20 = vector.load %arg3[%c3_11, %c0_12, %c0_13] : memref<4x52x52xf32, #tpu.memory_space<vmem>>, vector<1x52x52xf32>
    %21 = vector.shape_cast %20 : vector<1x52x52xf32> to vector<52x52xf32>
    %cst_14 = arith.constant dense<0.000000e+00> : vector<16x52xf32>
    %22 = tpu.matmul %19, %21, %cst_14 {dimension_numbers = #tpu.dot_dimension_numbers<[1], [0], [0], [1], [0, 0, 1, 1], [], []>} : vector<16x52xf32>, vector<52x52xf32>, vector<16x52xf32> -> vector<16x52xf32>
    %c2_15 = arith.constant 2 : index
    %c0_16 = arith.constant 0 : index
    %c0_17 = arith.constant 0 : index
    %23 = vector.load %arg3[%c2_15, %c0_16, %c0_17] : memref<4x52x52xf32, #tpu.memory_space<vmem>>, vector<1x52x52xf32>
    %24 = vector.shape_cast %23 : vector<1x52x52xf32> to vector<52x52xf32>
    %cst_18 = arith.constant dense<0.000000e+00> : vector<16x52xf32>
    %25 = tpu.matmul %19, %24, %cst_18 {dimension_numbers = #tpu.dot_dimension_numbers<[1], [0], [0], [1], [0, 0, 1, 1], [], []>} : vector<16x52xf32>, vector<52x52xf32>, vector<16x52xf32> -> vector<16x52xf32>
    %26 = vector.broadcast %14 : vector<16x1xf32> to vector<16x52xf32>
    %27 = arith.mulf %26, %22 : vector<16x52xf32>
    %28 = arith.addf %25, %27 : vector<16x52xf32>
    %c1_19 = arith.constant 1 : index
    %c0_20 = arith.constant 0 : index
    %c0_21 = arith.constant 0 : index
    %29 = vector.load %arg3[%c1_19, %c0_20, %c0_21] : memref<4x52x52xf32, #tpu.memory_space<vmem>>, vector<1x52x52xf32>
    %30 = vector.shape_cast %29 : vector<1x52x52xf32> to vector<52x52xf32>
    %cst_22 = arith.constant dense<0.000000e+00> : vector<16x52xf32>
    %31 = tpu.matmul %19, %30, %cst_22 {dimension_numbers = #tpu.dot_dimension_numbers<[1], [0], [0], [1], [0, 0, 1, 1], [], []>} : vector<16x52xf32>, vector<52x52xf32>, vector<16x52xf32> -> vector<16x52xf32>
    %32 = vector.broadcast %14 : vector<16x1xf32> to vector<16x52xf32>
    %33 = arith.mulf %32, %28 : vector<16x52xf32>
    %34 = arith.addf %31, %33 : vector<16x52xf32>
    %c0_23 = arith.constant 0 : index
    %c0_24 = arith.constant 0 : index
    %c0_25 = arith.constant 0 : index
    %35 = vector.load %arg3[%c0_23, %c0_24, %c0_25] : memref<4x52x52xf32, #tpu.memory_space<vmem>>, vector<1x52x52xf32>
    %36 = vector.shape_cast %35 : vector<1x52x52xf32> to vector<52x52xf32>
    %cst_26 = arith.constant dense<0.000000e+00> : vector<16x52xf32>
    %37 = tpu.matmul %19, %36, %cst_26 {dimension_numbers = #tpu.dot_dimension_numbers<[1], [0], [0], [1], [0, 0, 1, 1], [], []>} : vector<16x52xf32>, vector<52x52xf32>, vector<16x52xf32> -> vector<16x52xf32>
    %38 = vector.broadcast %14 : vector<16x1xf32> to vector<16x52xf32>
    %39 = arith.mulf %38, %34 : vector<16x52xf32>
    %40 = arith.addf %37, %39 : vector<16x52xf32>
    %41 = vector.broadcast %2 : vector<1x52xf32> to vector<16x52xf32>
    %42 = arith.subf %40, %41 : vector<16x52xf32>
    %43 = vector.broadcast %4 : vector<1x52xf32> to vector<16x52xf32>
    %44 = arith.mulf %42, %43 : vector<16x52xf32>
    %c0_27 = arith.constant 0 : index
    %c0_28 = arith.constant 0 : index
    %45 = vector.load %arg5[%c0_27, %c0_28] : memref<16x52xf32, #tpu.memory_space<vmem>>, vector<16x52xf32>
    tpu.vector_store %arg5[%c0_27, %c0_28], %44 {strides = array<i32>} : memref<16x52xf32, #tpu.memory_space<vmem>>, vector<16x52xf32>,
    return
  }
  func.func @transform_0(%arg0: i32) -> (i32, i32) {
    %c0_i32 = arith.constant 0 : i32
    %c0_i32_0 = arith.constant 0 : i32
    return %arg0, %c0_i32 : i32, i32
  }
  func.func @transform_1(%arg0: i32) -> (i32, i32) {
    %c0_i32 = arith.constant 0 : i32
    %c0_i32_0 = arith.constant 0 : i32
    %c0_i32_1 = arith.constant 0 : i32
    return %c0_i32, %c0_i32_0 : i32, i32
  }
  func.func @transform_2(%arg0: i32) -> (i32, i32, i32) {
    %c0_i32 = arith.constant 0 : i32
    %c0_i32_0 = arith.constant 0 : i32
    %c0_i32_1 = arith.constant 0 : i32
    %c0_i32_2 = arith.constant 0 : i32
    return %c0_i32, %c0_i32_0, %c0_i32_1 : i32, i32, i32
  }
  func.func @transform_3(%arg0: i32) -> (i32, i32) {
    %c0_i32 = arith.constant 0 : i32
    %c0_i32_0 = arith.constant 0 : i32
    %c0_i32_1 = arith.constant 0 : i32
    return %c0_i32, %c0_i32_0 : i32, i32
  }
  func.func @transform_4(%arg0: i32) -> (i32, i32) {
    %c0_i32 = arith.constant 0 : i32
    %c0_i32_0 = arith.constant 0 : i32
    return %arg0, %c0_i32 : i32, i32
  }
  func.func @transform_5(%arg0: i32) -> (i32, i32) {
    %c0_i32 = arith.constant 0 : i32
    %c0_i32_0 = arith.constant 0 : i32
    return %arg0, %c0_i32 : i32, i32
  }
}

</mosaic_0001>

<bundles_post_ra>
// kernel: allpass_warp_forward.1
= control target key start
LH: loop header
LB: loop body
LE: loop exit
PB: predicated region body
PF: predicated region fallthrough
CT: control target
= control target key end

     0   :  { %s1342_s0 = inlined_call_operand.vmem [shape: f32[32,52], index: 0, kind: input, shape index: {}]   ;;  %s1343_s1 = inlined_call_operand.vmem [shape: f32[4,52], index: 1, kind: input, shape index: {}]   ;;  %s1344_s2 = inlined_call_operand.vmem [shape: f32[4,52,52], index: 2, kind: input, shape index: {}]   ;;  %s1345_s3 = inlined_call_operand.<no memory space> [shape: f32[1,1], index: 3, kind: input, shape index: {}]   ;;  %s1346_s4 = inlined_call_operand.hbm [shape: f32[32,52], index: 4, kind: output, shape index: {0}]   ;;  %s1347_s5 = inlined_call_operand.vmem [shape: f32[32,1], index: 5, kind: output, shape index: {1}]  }
   0x1   :  { %11 = sst [smem:[#allocation2]] %s1345_s3 }
   0x2   :  { %12 = vsyncpa [#allocation4], 0 }
   0x3   :  { %14 = vsyncpa [#allocation4 + $0x1], 0  ;;  %s1108_s20 = smov 0   ;;  %s1110_s21 = smov 0  }
   0x4   :  { %s1112_s22 = smov 0   ;;  %s1114_s23 = smov 0  }
   0x5 LB: > { %s1129_s3 = sadd.s32 4294967295, %s1070_s23   ;;  %s759_s24 = sadd.s32 4294967294, %s1070_s23   ;;  %s1070_s23 = sphi %s1114_s23, %s1353_s23   ;;  %s1066_s22 = sphi %s1112_s22, %s1352_s22   ;;  %s1062_s21 = sphi %s1110_s21, %s1351_s21   ;;  %s1058_s20 = sphi %s1108_s20, %s1350_s20  }
   0x6   : > { %s1133_s25 = sadd.s32 1, %s1070_s23   ;;  %s116_s26 = sadd.s32 1, %s1066_s22 }
   0x7   : > { %s113_s27 = ssub.s32 %s1070_s23, %s1133_s25  ;;  %p126_p0 = scmp.ne.s32.totalorder %s1066_s22, %s1062_s21 }
   0x8   : > { %p114_p1 = scmp.eq.s32.totalorder %s113_s27, 0  ;;  %p127_p2 = scmp.eq.s32.totalorder %s1129_s3, 1 }
   0x9   : > { %p132_p3 = scmp.ne.s32.totalorder %s1062_s21, %s1058_s20  ;;  %p133_p4 = scmp.eq.s32.totalorder %s759_s24, 1 }
   0xa   : > { %s1144_s28 = scalar_select %p114_p1, %s1066_s22, %s116_s26  }
   0xb   : > { %p1146_p5 = por %p127_p2, %p126_p0  ;;  %p1150_p6 = por %p133_p4, %p132_p3 }
   0xc   : > { %p762_p7 = scmp.ge.s32.totalorder %s1070_s23, 1  ;;  %p195_p8 = scmp.lt.s32.totalorder %s1070_s23, 3 }
   0xe   : > { %p196_p9 = pnand %p762_p7, %p195_p8 }
   0xf   : > { %v771_v0 = vld [vmem:[%s1344_s2 + $0xa8] sm:$0xff] (!%p196_p9)  ;;  %v772_v1 = vld [vmem:[%s1344_s2 + $0xb0] sm:$0xff] (!%p196_p9)  ;;  %s764_s12 = sshll.u32 (!%p196_p9), %s1129_s3, 1  ;;  %v782_v4 = vld [vmem:[%s1344_s2 + $0x78] sm:$0xff] (!%p196_p9)  ;;  %vm253_vm0 = vcmask (!%p196_p9), 424960   ;;  %vm297_vm1 = vcmask (!%p196_p9), 1043456  }
  0x10   : > { %199 = sbr.rel (%p196_p9) target bundleno = 285 (0x11d), region = 36  ;;  %v781_v2 = vld [vmem:[%s1344_s2 + $0x70] sm:$0xff] (!%p196_p9)  ;;  %v915_v3 = vpack.c.bf16 (!%p196_p9), %v772_v1, %v771_v0  ;;  %v773_v5 = vld [vmem:[%s1344_s2 + $0xb8] sm:$0xff] (!%p196_p9)  ;;  %v774_v6 = vld [vmem:[%s1344_s2 + $0xc0] sm:$0xff] (!%p196_p9)  ;;  %p229_p10 = scmp.lt.s32.totalorder (!%p196_p9), %s764_s12, 3  ;;  %vm268_vm2 = vcmask (!%p196_p9), 7168  }
  0x11   : > { %v927_v7 = vpack.c.bf16 (!%p196_p9), %v782_v4, %v781_v2  ;;  %v919_v8 = vpack.c.bf16 (!%p196_p9), %v774_v6, %v773_v5  ;;  %v783_v9 = vld [vmem:[%s1344_s2 + $0x80] sm:$0xff] (!%p196_p9)  ;;  %v784_v10 = vld [vmem:[%s1344_s2 + $0x88] sm:$0xff] (!%p196_p9)  ;;  %v776_v13 = vld [vmem:[%s1344_s2 + $0xd0] sm:$0xff] (!%p196_p9)  ;;  %s260_s10 = sld [smem:[#allocation2]] (!%p196_p9)  ;;  %s810_s18 = sshll.u32 (!%p196_p9), %s1129_s3, 8 }
  0x12   : > { %v775_v11 = vld [vmem:[%s1344_s2 + $0xc8] sm:$0xff] (!%p196_p9)  ;;  %916 = vmatprep.subr.bf16.mxu0 (!%p196_p9), %v915_v3  ;;  %v931_v12 = vpack.c.bf16 (!%p196_p9), %v784_v10, %v783_v9  ;;  %v785_v14 = vld [vmem:[%s1344_s2 + $0x90] sm:$0xff] (!%p196_p9)  ;;  %v786_v15 = vld [vmem:[%s1344_s2 + $0x98] sm:$0xff] (!%p196_p9)  ;;  %s1295_s6 = scalar_lea.hbm (!%p196_p9), %s1346_s4, %s810_s18  ;;  %s1072_s8 = smov (!%p196_p9), [#allocation3]  }
  0x13   : > { %918 = vmatpush3.bf16.msra.mxu0 (!%p196_p9), %v915_v3  ;;  %928 = vmatprep.subr.bf16.mxu1 (!%p196_p9), %v927_v7  ;;  %v923_v16 = vpack.c.bf16 (!%p196_p9), %v776_v13, %v775_v11  ;;  %v769_v17 = vld [vmem:[%s1343_s1 + $0x2] ss:$0 sm:$0xff] (!%p196_p9)  ;;  %v935_v18 = vpack.c.bf16 (!%p196_p9), %v786_v15, %v785_v14  ;;  %v1207_v20 = vld [vmem:[%s1343_s1 + $0x1] ss:$0 sm:$0xff] (!%p196_p9)  ;;  %v777_v23 = vld [vmem:[%s1344_s2 + $0xd8] sm:$0xf] (!%p196_p9) }
  0x14   : > { %930 = vmatpush3.bf16.msra.mxu1 (!%p196_p9), %v927_v7  ;;  %920 = vmatprep.subr.bf16.mxu0 (!%p196_p9), %v919_v8  ;;  %v791_v26 = vld [vmem:[%s1344_s2 + $0x38] sm:$0xff] (!%p196_p9)  ;;  %v792_v27 = vld [vmem:[%s1344_s2 + $0x40] sm:$0xff] (!%p196_p9)  ;;  %v553_v32 = vld [vmem:[%s1344_s2 + $0x8] sm:$0xff] (!%p196_p9)  ;;  %s1012_s9 = sshll.u32 (!%p196_p9), %s1072_s8, 4  ;;  %s1013_s9 = int_to_ptr.vmem [resolvable:$false] %s1012_s9 }
  0x15   : > { %932 = vmatprep.subr.bf16.mxu1 (!%p196_p9), %v931_v12  ;;  %v768_v28 = vld [vmem:[%s1343_s1] ss:$0 sm:$0xff] (!%p196_p9)  ;;  %v939_v34 = vpack.c.bf16 (!%p196_p9), %v792_v27, %v791_v26  ;;  %v793_v35 = vld [vmem:[%s1344_s2 + $0x48] sm:$0xff] (!%p196_p9)  ;;  %v794_v36 = vld [vmem:[%s1344_s2 + $0x50] sm:$0xff] (!%p196_p9) }
  0x16   : > { %v787_v29 = vld [vmem:[%s1344_s2 + $0xa0] sm:$0xf] (!%p196_p9)  ;;  %v554_v38 = vld [vmem:[%s1344_s2 + $0x10] sm:$0xff] (!%p196_p9)  ;;  %v555_v39 = vld [vmem:[%s1344_s2 + $0x18] sm:$0xff] (!%p196_p9)  ;;  %v943_v41 = vpack.c.bf16 (!%p196_p9), %v794_v36, %v793_v35 }
  0x17   : > { %s1355_s12 = smov (!%p229_p10, %s764_s12), 3  ;;  %922 = vmatpush3.bf16.msra.mxu0 %v919_v8  ;;  %v552_v31 = vld [vmem:[%s1344_s2] sm:$0xff]  ;;  %v795_v42 = vld [vmem:[%s1344_s2 + $0x58] sm:$0xff]  ;;  %v955_v45 = vpack.c.bf16 %v555_v39, %v554_v38  ;;  %v557_v47 = vld [vmem:[%s1344_s2 + $0x28] sm:$0xff]  ;;  %v261_v53 = vstv %s260_s10  ;;  %s1014_s10 = scalar_lea.vmem %s1013_s9, 512 }
  0x18   : > { %s765_s15 = sshll.u32 %s1355_s12, 3  ;;  %934 = vmatpush3.bf16.msra.mxu1 %v931_v12  ;;  %924 = vmatprep.subr.bf16.mxu0 %v923_v16  ;;  %v951_v40 = vpack.c.bf16 %v553_v32, %v552_v31  ;;  %v796_v43 = vld [vmem:[%s1344_s2 + $0x60] sm:$0xff]  ;;  %v797_v51 = vld [vmem:[%s1344_s2 + $0x68] sm:$0xf]  ;;  %v558_v52 = vld [vmem:[%s1344_s2 + $0x30] sm:$0xf] }
  0x19   : > { %s232_s24 = scalar_lea.vmem %s1342_s0, %s765_s15  ;;  %936 = vmatprep.subr.bf16.mxu1 %v935_v18  ;;  %v556_v46 = vld [vmem:[%s1344_s2 + $0x20] sm:$0xff]  ;;  %v947_v48 = vpack.c.bf16 %v796_v43, %v795_v42  ;;  %s239_s14 = scalar_lea.vmem %s1347_s5, %s765_s15 }
  0x1a   : > { %v241_v19 = vld [vmem:[%s232_s24] sm:$0xff]  ;;  %v242_v21 = vld [vmem:[%s232_s24 + $0x8] sm:$0xff]  ;;  %v959_v50 = vpack.c.bf16 %v557_v47, %v556_v46  ;;  %s218_s12 = sand.u32 1, %s1062_s21  }
  0x1b   : > { %v275_v22 = vmul.f32 %v769_v17, %v241_v19  ;;  %v276_v24 = vmul.f32 %v769_v17, %v242_v21  ;;  %v251_v30 = vmul.f32 %v768_v28, %v241_v19  ;;  %926 = vmatpush3.bf16.msra.mxu0 %v923_v16  ;;  %v252_v44 = vmul.f32 %v768_v28, %v242_v21  ;;  %s763_s15 = sshll.u32 %s218_s12, 4  ;;  %v804_v17 = vld [vmem:[%s1343_s1 + $0x3] ss:$0 sm:$0xff]  ;;  %s1301_s3 = scalar_lea.sflag [#allocation4], %s218_s12 }
  0x1c   : > { %938 = vmatpush3.bf16.msra.mxu1 %v935_v18  ;;  %859 = vmatprep.subr.msk.mxu0 %vm297_vm1, %v777_v23  ;;  %s220_s19 = scalar_lea.vmem [#allocation3], %s763_s15 }
  0x1d   : > { %v281_v25 = vadd.f32 %v1207_v20, %v275_v22  ;;  %v282_v33 = vadd.f32 %v1207_v20, %v276_v24  ;;  %v254_v37 = vsel %vm253_vm0, %v251_v30, 0.0  ;;  %876 = vmatprep.subr.msk.mxu1 %vm297_vm1, %v787_v29  ;;  %v257_v49 = vsel %vm253_vm0, %v252_v44, 0.0  ;;  %s668_s24 = sshll.u32 %s220_s19, 4  ;;  %s1297_s24 = int_to_ptr.vmem [resolvable:$true] %s668_s24 }
  0x1e   : > { %255 = vadd.xlane.f32.xlu0 %v254_v37  ;;  %s1008_s7 = scalar_lea.vmem %s1297_s24, 256  ;;  %p1015_p0 = scmp.lt.s32.totalorder %s1297_s24, %s1013_s9 }
  0x1f   : > { %861 = vmatprep.mubr.msk.f32.mxu0 %vm253_vm0, %v281_v25  ;;  %878 = vmatprep.mubr.msk.f32.mxu1 %vm253_vm0, %v281_v25  ;;  %p1009_p11 = scmp.ne.s32.totalorder %s1297_s24, %s1008_s7  ;;  %p1016_p1 = scmp.lt.s32.totalorder %s1014_s10, %s1008_s7 }
  0x20   : > { %860 = vmatpush3.msk.msra.mxu0 %vm297_vm1, %v777_v23  ;;  %877 = vmatpush3.msk.msra.mxu1 %vm297_vm1, %v787_v29 }
  0x21   : > { %862 = vmatmul.mubr.msk.f32.vlgmr.msra.gmra.mrb[0].mxu0 %vm253_vm0, %v282_v33  ;;  %940 = vmatprep.subr.bf16.mxu0 %v939_v34  ;;  %p1010_p12 = pnand %p1009_p11, %p1146_p5  ;;  %p1017_p2 = por %p1016_p1, %p1015_p0 }
  0x22   : > { %942 = vmatpush3.bf16.msra.mxu0 %v939_v34  ;;  %879 = vmatmul.mubr.msk.f32.vlgmr.msra.gmra.mrb[0].mxu1 %vm253_vm0, %v282_v33 }
  0x23   : > { %952 = vmatprep.subr.bf16.mxu1 %v951_v40  ;;  %944 = vmatprep.subr.bf16.mxu0 %v943_v41  ;;  %p1011_p13 = pneg %p1010_p12 }
  0x24   : > { %954 = vmatpush3.bf16.msra.mxu1 %v951_v40  ;;  %895 = vmatprep.mubr.msk.f32.mxu0 %vm253_vm0, %v281_v25 }
  0x25   : > { %956 = vmatprep.subr.bf16.mxu1 %v955_v45  ;;  %912 = vmatprep.mubr.msk.f32.mxu1 %vm253_vm0, %v281_v25  ;;  %p1018_p3 = pnand %p1017_p2, %p1011_p13 }
  0x26   : > { %946 = vmatpush3.bf16.msra.mxu0 %v943_v41  ;;  %258 = vadd.xlane.f32.xlu0 %v257_v49 }
  0x27   : > { %948 = vmatprep.subr.bf16.mxu0 %v947_v48 }
  0x28   : > { %958 = vmatpush3.bf16.msra.mxu1 %v955_v45 }
  0x29   : > { %960 = vmatprep.subr.bf16.mxu1 %v959_v50 }
  0x2a   : > { %950 = vmatpush3.bf16.msra.mxu0 %v947_v48 }
  0x2b   : > { %893 = vmatprep.subr.msk.mxu0 %vm297_vm1, %v797_v51 }
  0x2c   : > { %962 = vmatpush3.bf16.msra.mxu1 %v959_v50 }
  0x2d   : > { %910 = vmatprep.subr.msk.mxu1 %vm297_vm1, %v558_v52 }
  0x2e   : > { %894 = vmatpush3.msk.msra.mxu0 %vm297_vm1, %v797_v51 }
  0x2f   : > { %896 = vmatmul.mubr.msk.f32.vlgmr.msra.gmra.mrb[2].mxu0 %vm253_vm0, %v282_v33 }
  0x30   : > { %911 = vmatpush3.msk.msra.mxu1 %vm297_vm1, %v558_v52 }
  0x31   : > { %913 = vmatmul.mubr.msk.f32.vlgmr.msra.gmra.mrb[2].mxu1 %vm253_vm0, %v282_v33 }
  0xab   : > { %v256_v54 = vpop.xlane.xlu0 %255 }
  0xac   : > { %v262_v55 = vadd.f32 %v261_v53, %v256_v54 }
  0xae   : > { %1004 = vtanh.f32 %v262_v55 }
  0xb3   : > { %v259_v56 = vpop.xlane.xlu0 %258 }
  0xb4   : > { %v263_v57 = vadd.f32 %v261_v53, %v259_v56 }
  0xb6   : > { %1006 = vtanh.f32 %v263_v57 }
  0xb8   : > { %v1005_v58 = vpop.eup %1004 }
  0xb9   : > { %v266_v59 = vmul.f32 0.2, %v1005_v58 }
  0xbb   : > { %269 = vst.msk [vmem:[%s239_s14] sm:$0xff] %vm268_vm2, %v266_v59 }
  0xc0   : > { %v1007_v60 = vpop.eup %1006 }
  0xc1   : > { %v267_v61 = vmul.f32 0.2, %v1007_v60 }
  0xc3   : > { %270 = vst.msk [vmem:[%s239_s14 + $0x8] sm:$0xff] %vm268_vm2, %v267_v61 }
  0xf4   : > { %v863_v62 = vpop.f32.mrb[0].mxu0 }
  0xf5   : > { %v385_v63 = vmul.f32 %v863_v62, %v267_v61  ;;  %v367_v0 = vpop.f32.mrb[1].mxu0  ;;  %v880_v2 = vpop.f32.mrb[0].mxu1 }
  0xf6   : > { %v384_v1 = vmul.f32 %v367_v0, %v266_v59  ;;  %v455_v4 = vpop.f32.mrb[1].mxu1 }
  0xf7   : > { %v461_v3 = vadd.f32 %v880_v2, %v385_v63 }
  0xf8   : > { %v456_v5 = vadd.f32 %v455_v4, %v384_v1 }
  0xf9   : > { %v473_v6 = vmul.f32 %v461_v3, %v267_v61 }
  0xfa   : > { %v472_v8 = vmul.f32 %v456_v5, %v266_v59 }
 0x102   : > { %v897_v7 = vpop.f32.mrb[2].mxu0 }
 0x103   : > { %v549_v9 = vadd.f32 %v897_v7, %v473_v6  ;;  %v543_v10 = vpop.f32.mrb[3].mxu0 }
 0x104   : > { %v544_v11 = vadd.f32 %v543_v10, %v472_v8  ;;  %v914_v12 = vpop.f32.mrb[2].mxu1 }
 0x105   : > { %v560_v13 = vmul.f32 %v549_v9, %v267_v61  ;;  %v630_v14 = vpop.f32.mrb[3].mxu1 }
 0x106   : > { %v559_v15 = vmul.f32 %v544_v11, %v266_v59 }
 0x107   : > { %v636_v16 = vadd.f32 %v914_v12, %v560_v13 }
 0x108   : > { %v631_v18 = vadd.f32 %v630_v14, %v559_v15 }
 0x109   : > { %v640_v19 = vsub.f32 %v636_v16, %v1207_v20 }
 0x10a   : > { %v639_v21 = vsub.f32 %v631_v18, %v1207_v20 }
 0x10b   : > { %v646_v22 = vmul.f32 %v804_v17, %v640_v19 }
 0x10c   : > { %v645_v23 = vmul.f32 %v804_v17, %v639_v21 }
 0x10d   : > { %648 = vst.msk [vmem:[%s220_s19 + $0x8] sm:$0xff] %vm253_vm0, %v646_v22 }
 0x10e   : > { %647 = vst.msk [vmem:[%s220_s19] sm:$0xff] %vm253_vm0, %v645_v23 }
 0x10f   : > { %1021 = shalt.err (!%p1018_p3)
}
 0x110   : > { %s1022_s11 = scalar_lea.hbm %s1295_s6, 256  ;;  %s1026_s12 = scalar_lea.hbm %s1346_s4, 512 }
 0x111   : > { %p1023_p4 = scmp.ne.s32.totalorder %s1295_s6, %s1022_s11  ;;  %p1027_p9 = scmp.lt.u32.totalorder %s1295_s6, %s1346_s4 }
 0x112   : > { %p1028_p10 = scmp.lt.u32.totalorder %s1026_s12, %s1022_s11  ;;  %p1030_p12 = scmp.lt.u32.totalorder %s1022_s11, %s1295_s6 }
 0x113   : > { %p1024_p7 = pnand %p1023_p4, %p1146_p5 }
 0x114   : > { %p1029_p11 = por %p1028_p10, %p1027_p9 }
 0x115   : > { %p1025_p8 = pneg %p1024_p7 }
 0x116   : > { %p1031_p13 = por %p1030_p12, %p1029_p11 }
 0x118   : > { %p1032_p0 = pnand %p1031_p13, %p1025_p8 }
 0x11a   : > { %1035 = shalt.err (!%p1032_p0)
}
 0x11b   : > { %s1073_s17 = smov 128   ;;  %s1074_s18 = smov 8  }
 0x11c   : > { %963 = dma.vmem_to_hbm [thread:$0]  (%p1146_p5), %s1297_s24, 256, %s1295_s6, %s1301_s3, %s1073_s17, %s1073_s17, %s1074_s18  }
 0x11d PF: > { %p969_p1 = scmp.ge.s32.totalorder %s1070_s23, 2  ;;  %s687_s19 = sand.u32 1, %s1058_s20  }
 0x11e   : > { %s688_s26 = scalar_lea.sflag [#allocation4], %s687_s19 }
 0x11f   : > { %p966_p2 = pnand %p969_p1, %p1150_p6 }
 0x121   : > { %1053 = dma.done.wait (!%p966_p2), %s688_s26, 256  }
 0x122   : > { %1055 = vsyncadd (!%p966_p2), %s688_s26, 4294967040  ;;  %p17_p3 = scmp.ge.s32.totalorder %s1133_s25, 4   ;;  %s1350_s20 = smov %s1062_s21 }
 0x123   : > { %s1351_s21 = smov %s1066_s22  ;;  %s1352_s22 = smov %s1144_s28 }
 0x124   : > { %s1353_s23 = smov %s1133_s25  ;;  %19 = sbr.rel (!%p17_p3) target bundleno = 5 (0x5), region = 86 }
 0x12b   :  { %701 = vsyncpa [#allocation4], 1 }
 0x12c   :  { %703 = vsyncpa [#allocation4 + $0x1], 1 }

</bundles_post_ra>
